<compile_context>
chip_gen: v5e
topology: v5e:2x2
jax: 0.10.0
libtpu: 0.0.40
codegen_flags: <defaults>
</compile_context>

<pallas_src>
import jax
import jax.numpy as jnp
from jax.experimental import pallas as pl
from jax.experimental.pallas import tpu as pltpu


def _round_up(n, m):
    return ((n + m - 1) // m) * m


def _cdiv(a, b):
    return (a + b - 1) // b


def _sublane_multiple(dtype):
    return {1: 32, 2: 16}.get(jnp.dtype(dtype).itemsize, 8)


def _vmem_capacity_bytes():
    """Physical VMEM per TensorCore; 128 MiB fallback if the query fails."""
    try:
        cap = getattr(pltpu.get_tpu_info(), "vmem_capacity_bytes", None)
        if cap:
            return int(cap)
    except Exception:
        pass
    return 128 << 20


# ---------------------------------------------------------------------------
# Kernel A: full dmodel resident (weights fit in VMEM).
# ---------------------------------------------------------------------------
def esm_lm_head_kernel(x_ref, wd_ref, bd_ref, g_ref, b_ref, wdec_ref, o_ref):
    # x_ref:    (TM, D)   row tile, MXU dtype (bf16)
    # wd_ref:   (D, D)    dense weight [in, out], MXU dtype, resident
    # bd_ref:   (1, D)    dense bias, f32
    # g_ref:    (1, D)    layernorm gamma, f32
    # b_ref:    (1, D)    layernorm beta, f32
    # wdec_ref: (D, Vp)   decoder weight [in, out], lane-padded, resident
    # o_ref:    (TM, Vp)  logits tile (lane-dense, padded)
    h = jnp.dot(x_ref[...], wd_ref[...], preferred_element_type=jnp.float32)
    h = h + bd_ref[...]

    # LayerNorm (f32, eps=1e-5).  Two-pass variance kept: at D >= 1024 this
    # VPU work is free filler under the MXU; only fold gamma / one-pass the
    # variance if a bundle dump shows the VALU slot saturated at small D.
    mean = jnp.mean(h, axis=-1, keepdims=True)
    centered = h - mean
    var = jnp.mean(centered * centered, axis=-1, keepdims=True)
    hn = centered * jax.lax.rsqrt(var + 1e-5)
    hn = hn * g_ref[...] + b_ref[...]

    out = jnp.dot(hn.astype(wdec_ref.dtype), wdec_ref[...],
                  preferred_element_type=jnp.float32)
    o_ref[...] = out.astype(o_ref.dtype)


# ---------------------------------------------------------------------------
# Kernel B: K-tiled dense matmul for hidden sizes whose resident DxD weight
# does not fit VMEM.  The dense matmul accumulates into an f32 scratch and
# LayerNorm + decoder run once at the last K step.
# ---------------------------------------------------------------------------
def esm_lm_head_kernel_ktiled(x_ref, wd_ref, bd_ref, g_ref, b_ref, wdec_ref,
                              o_ref, acc_ref):
    k = pl.program_id(1)

    @pl.when(k == 0)
    def _():
        acc_ref[...] = jnp.zeros_like(acc_ref)

    acc_ref[...] += jnp.dot(x_ref[...], wd_ref[...],
                            preferred_element_type=jnp.float32)

    @pl.when(k == pl.num_programs(1) - 1)
    def _():
        h = acc_ref[...] + bd_ref[...]
        mean = jnp.mean(h, axis=-1, keepdims=True)
        centered = h - mean
        var = jnp.mean(centered * centered, axis=-1, keepdims=True)
        hn = centered * jax.lax.rsqrt(var + 1e-5)
        hn = hn * g_ref[...] + b_ref[...]
        out = jnp.dot(hn.astype(wdec_ref.dtype), wdec_ref[...],
                      preferred_element_type=jnp.float32)
        o_ref[...] = out.astype(o_ref.dtype)


def esm_lm_head(x, w_dense, b_dense, ln_gamma, ln_beta, w_decoder,
                *, mxu_dtype=jnp.bfloat16, tm=None):
    """x: [batch, seq, dmodel] -> logits [batch, seq, vocab].

    w_dense: [dmodel, dmodel] ([in, out]); b_dense: [dmodel]
    ln_gamma / ln_beta: [dmodel]; w_decoder: [dmodel, vocab] ([in, out]).
    Matmul operands are fed to the MXU in `mxu_dtype` (bf16 by default);
    accumulation and LayerNorm math are f32; logits are returned in x.dtype.
    """
    batch, seq, D = x.shape
    vocab = w_decoder.shape[1]
    M = batch * seq
    out_dtype = x.dtype

    cdt = jnp.dtype(mxu_dtype) if mxu_dtype is not None else jnp.dtype(x.dtype)
    x2d = x.reshape(M, D).astype(cdt)
    wd = w_dense.astype(cdt)
    wdec = w_decoder.astype(cdt)
    bd2d = b_dense.reshape(1, D).astype(jnp.float32)
    g2d = ln_gamma.reshape(1, D).astype(jnp.float32)
    be2d = ln_beta.reshape(1, D).astype(jnp.float32)

    # Lane-pad the tiny vocab to exactly one 128-lane slab -> unmasked stores.
    Vp = _round_up(max(vocab, 128), 128)
    if Vp != vocab:
        wdec = jnp.pad(wdec, ((0, 0), (0, Vp - vocab)))

    # Pad rows only up to the sublane multiple (< sub rows of pad); grids that
    # don't divide Ma rely on Pallas boundary masking (no full pad copy).
    sub = _sublane_multiple(cdt)
    Ma = _round_up(M, sub)
    if Ma != M:
        x2d = jnp.pad(x2d, ((0, Ma - M), (0, 0)))

    isz = jnp.dtype(cdt).itemsize
    osz = jnp.dtype(out_dtype).itemsize

    vmem_cap = _vmem_capacity_bytes()
    vmem_budget = max(vmem_cap - (12 << 20), 32 << 20)  # compiler headroom

    w_resident = D * D * isz + D * Vp * isz + 3 * D * 4  # single-buffered

    def tiles_bytes(t, kdim):
        # double-buffered x / out tiles + f32 LN intermediates
        return 2 * t * kdim * isz + 2 * t * Vp * osz + 4 * t * D * 4

    def resident_bytes(t):
        return w_resident + tiles_bytes(t, D)

    # K-tile the dense matmul only if a resident DxD weight cannot support a
    # reasonable row tile (e.g. large-D ESM on v7x's 64 MiB per-TC VMEM).
    use_ktiled = resident_bytes(min(max(sub, 128), Ma)) > vmem_budget
    tk = D
    if use_ktiled:
        tk = next((c for c in (1024, 512, 256, 128) if D % c == 0), D)

        def footprint(t):
            return (2 * t * tk * isz + 2 * tk * D * isz      # streamed x / Wd
                    + D * Vp * isz + 3 * D * 4               # resident dec W
                    + 2 * t * Vp * osz + 4 * t * D * 4)      # out + acc + LN
    else:
        footprint = resident_bytes

    # Row tile: large on 128 MiB chips, 256 on v7x; sublane-aligned; >= 2 grid
    # steps where M allows (megacore); shrink until the plan fits VMEM.
    if tm is None:
        tm = 512 if vmem_cap >= (96 << 20) else 256
    tm = max(sub, min(_round_up(tm, sub), Ma))
    if Ma >= 2 * sub:
        tm = min(tm, _round_up(_cdiv(Ma, 2), sub))
    while tm > sub and footprint(tm) > vmem_budget:
        tm = max(sub, _round_up(tm // 2, sub))

    grid_rows = _cdiv(Ma, tm)

    cost = pl.CostEstimate(
        flops=2 * Ma * D * D + 2 * Ma * D * Vp + 10 * Ma * D,
        transcendentals=Ma,
        bytes_accessed=(Ma * D * isz + D * D * isz + D * Vp * isz
                        + 3 * D * 4 + Ma * Vp * osz),
    )

    def run_resident(single_buffer):
        pm = {"pipeline_mode": pl.Buffered(1)} if single_buffer else {}
        in_specs = [
            pl.BlockSpec((tm, D), lambda i: (i, 0)),          # x row tile
            pl.BlockSpec((D, D), lambda i: (0, 0), **pm),     # dense W
            pl.BlockSpec((1, D), lambda i: (0, 0), **pm),     # dense b
            pl.BlockSpec((1, D), lambda i: (0, 0), **pm),     # ln gamma
            pl.BlockSpec((1, D), lambda i: (0, 0), **pm),     # ln beta
            pl.BlockSpec((D, Vp), lambda i: (0, 0), **pm),    # decoder W
        ]
        est = (1 if single_buffer else 2) * w_resident + tiles_bytes(tm, D)
        vmem_limit = int(min(max(est * 5 // 4, 32 << 20), vmem_budget))
        return pl.pallas_call(
            esm_lm_head_kernel,
            out_shape=jax.ShapeDtypeStruct((Ma, Vp), out_dtype),
            grid_spec=pltpu.PrefetchScalarGridSpec(
                num_scalar_prefetch=0,
                grid=(grid_rows,),
                in_specs=in_specs,
                out_specs=pl.BlockSpec((tm, Vp), lambda i: (i, 0)),
            ),
            compiler_params=pltpu.CompilerParams(
                dimension_semantics=("parallel",),
                vmem_limit_bytes=vmem_limit),
            cost_estimate=cost,
        )(x2d, wd, bd2d, g2d, be2d, wdec)

    def run_ktiled(single_buffer):
        pm = {"pipeline_mode": pl.Buffered(1)} if single_buffer else {}
        n_k = D // tk
        in_specs = [
            pl.BlockSpec((tm, tk), lambda i, k: (i, k)),       # x tile
            pl.BlockSpec((tk, D), lambda i, k: (k, 0)),        # dense W slab
            pl.BlockSpec((1, D), lambda i, k: (0, 0), **pm),   # dense b
            pl.BlockSpec((1, D), lambda i, k: (0, 0), **pm),   # ln gamma
            pl.BlockSpec((1, D), lambda i, k: (0, 0), **pm),   # ln beta
            pl.BlockSpec((D, Vp), lambda i, k: (0, 0), **pm),  # decoder W
        ]
        est = footprint(tm)
        vmem_limit = int(min(max(est * 5 // 4, 32 << 20), vmem_budget))
        return pl.pallas_call(
            esm_lm_head_kernel_ktiled,
            out_shape=jax.ShapeDtypeStruct((Ma, Vp), out_dtype),
            grid_spec=pltpu.PrefetchScalarGridSpec(
                num_scalar_prefetch=0,
                grid=(grid_rows, n_k),
                in_specs=in_specs,
                out_specs=pl.BlockSpec((tm, Vp), lambda i, k: (i, 0)),
                scratch_shapes=[pltpu.VMEM((tm, D), jnp.float32)],
            ),
            compiler_params=pltpu.CompilerParams(
                dimension_semantics=("parallel", "arbitrary"),
                vmem_limit_bytes=vmem_limit),
            cost_estimate=cost,
        )(x2d, wd, bd2d, g2d, be2d, wdec)

    runner = run_ktiled if use_ktiled else run_resident
    try:
        out = runner(True)
    except Exception:
        # pipeline_mode=pl.Buffered(1) not honored on this jax version:
        # fall back to the default (double-buffered) resident specs.
        out = runner(False)

    return out[:M, :vocab].reshape(batch, seq, vocab)


def xavier_uniform(key, fan_in, fan_out, dtype=jnp.float32):
    bound = (6.0 / (fan_in + fan_out)) ** 0.5
    # stored directly as [in, out] (transposed vs. PyTorch's [out, in])
    return jax.random.uniform(key, (fan_in, fan_out), dtype,
                              minval=-bound, maxval=bound)


if __name__ == "__main__":
    batch, seq, dmodel, vocab = 2, 8, 32, 33

    key = jax.random.PRNGKey(0)
    k_x, k_wd, k_bd, k_wdec = jax.random.split(key, 4)

    x = jax.random.normal(k_x, (batch, seq, dmodel), jnp.float32)

    # dense: xavier_uniform weight, PyTorch-default uniform bias
    w_dense = xavier_uniform(k_wd, dmodel, dmodel)
    bnd = 1.0 / (dmodel ** 0.5)
    b_dense = jax.random.uniform(k_bd, (dmodel,), jnp.float32,
                                 minval=-bnd, maxval=bnd)
    # layer norm affine defaults
    ln_gamma = jnp.ones((dmodel,), jnp.float32)
    ln_beta = jnp.zeros((dmodel,), jnp.float32)
    # decoder: xavier_uniform, no bias
    w_decoder = xavier_uniform(k_wdec, dmodel, vocab)

    out = esm_lm_head(x, w_dense, b_dense, ln_gamma, ln_beta, w_decoder)
    out = jax.block_until_ready(out)

    # Reference in plain JAX mirroring the kernel's bf16-operand / f32-accum
    # math (the kernel feeds the MXU bf16 and accumulates / LayerNorms in f32).
    cd = jnp.bfloat16
    xb = x.reshape(-1, dmodel).astype(cd)
    h = jnp.dot(xb, w_dense.astype(cd),
                preferred_element_type=jnp.float32) + b_dense
    mu = h.mean(-1, keepdims=True)
    var = ((h - mu) ** 2).mean(-1, keepdims=True)
    hn = (h - mu) * jax.lax.rsqrt(var + 1e-5) * ln_gamma + ln_beta
    ref = jnp.dot(hn.astype(cd), w_decoder.astype(cd),
                  preferred_element_type=jnp.float32).astype(x.dtype)
    ref = ref.reshape(batch, seq, vocab)

    assert out.shape == ref.shape, "shape mismatch vs reference"
    assert jnp.allclose(out, ref, atol=5e-3, rtol=5e-3), "mismatch vs reference"

    print("KERNEL_OK")
</pallas_src>

<mosaic_0001>
module attributes {stable_mosaic.version = 11 : i64} {
  func.func @esm_lm_head_kernel(%arg0: i32, %arg1: memref<16x32xbf16, #tpu.memory_space<vmem>>, %arg2: memref<32x32xbf16, #tpu.memory_space<vmem>>, %arg3: memref<1x32xf32, #tpu.memory_space<vmem>>, %arg4: memref<1x32xf32, #tpu.memory_space<vmem>>, %arg5: memref<1x32xf32, #tpu.memory_space<vmem>>, %arg6: memref<32x128xbf16, #tpu.memory_space<vmem>>, %arg7: memref<16x128xf32, #tpu.memory_space<vmem>>) attributes {dimension_semantics = [#tpu.dimension_semantics<parallel>], iteration_bounds = array<i64: 1>, scalar_prefetch = 0 : i64, scratch_operands = 0 : i64, tpu.core_type = #tpu.core_type<tc>, window_params = [{transform_indices = @transform_0, window_bounds = array<i64: 16, 32>}, {pipeline_mode = #tpu.pipeline_mode<synchronous>, transform_indices = @transform_1, window_bounds = array<i64: 32, 32>}, {pipeline_mode = #tpu.pipeline_mode<synchronous>, transform_indices = @transform_2, window_bounds = array<i64: 1, 32>}, {pipeline_mode = #tpu.pipeline_mode<synchronous>, transform_indices = @transform_3, window_bounds = array<i64: 1, 32>}, {pipeline_mode = #tpu.pipeline_mode<synchronous>, transform_indices = @transform_4, window_bounds = array<i64: 1, 32>}, {pipeline_mode = #tpu.pipeline_mode<synchronous>, transform_indices = @transform_5, window_bounds = array<i64: 32, 128>}, {transform_indices = @transform_6, window_bounds = array<i64: 16, 128>}]} {
    %c0 = arith.constant 0 : index
    %c0_0 = arith.constant 0 : index
    %0 = vector.load %arg1[%c0, %c0_0] : memref<16x32xbf16, #tpu.memory_space<vmem>>, vector<16x32xbf16>
    %c0_1 = arith.constant 0 : index
    %c0_2 = arith.constant 0 : index
    %1 = vector.load %arg2[%c0_1, %c0_2] : memref<32x32xbf16, #tpu.memory_space<vmem>>, vector<32x32xbf16>
    %cst = arith.constant dense<0.000000e+00> : vector<16x32xf32>
    %2 = tpu.matmul %0, %1, %cst {dimension_numbers = #tpu.dot_dimension_numbers<[1], [0], [0], [1], [0, 0, 1, 1], [], []>} : vector<16x32xbf16>, vector<32x32xbf16>, vector<16x32xf32> -> vector<16x32xf32>
    %c0_3 = arith.constant 0 : index
    %c0_4 = arith.constant 0 : index
    %3 = vector.load %arg3[%c0_3, %c0_4] : memref<1x32xf32, #tpu.memory_space<vmem>>, vector<1x32xf32>
    %4 = vector.broadcast %3 : vector<1x32xf32> to vector<16x32xf32>
    %5 = arith.addf %2, %4 : vector<16x32xf32>
    %cst_5 = arith.constant dense<0.000000e+00> : vector<16xf32>
    %6 = vector.multi_reduction <add>, %5, %cst_5 [1] : vector<16x32xf32> to vector<16xf32>
    %7 = vector.shape_cast %6 : vector<16xf32> to vector<16x1xf32>
    %cst_6 = arith.constant 3.200000e+01 : f32
    %8 = vector.broadcast %cst_6 : f32 to vector<16x1xf32>
    %9 = arith.divf %7, %8 : vector<16x1xf32>
    %10 = vector.broadcast %9 : vector<16x1xf32> to vector<16x32xf32>
    %11 = arith.subf %5, %10 : vector<16x32xf32>
    %12 = arith.mulf %11, %11 : vector<16x32xf32>
    %cst_7 = arith.constant dense<0.000000e+00> : vector<16xf32>
    %13 = vector.multi_reduction <add>, %12, %cst_7 [1] : vector<16x32xf32> to vector<16xf32>
    %14 = vector.shape_cast %13 : vector<16xf32> to vector<16x1xf32>
    %cst_8 = arith.constant 3.200000e+01 : f32
    %15 = vector.broadcast %cst_8 : f32 to vector<16x1xf32>
    %16 = arith.divf %14, %15 : vector<16x1xf32>
    %cst_9 = arith.constant 9.99999974E-6 : f32
    %17 = vector.broadcast %cst_9 : f32 to vector<16x1xf32>
    %18 = arith.addf %16, %17 : vector<16x1xf32>
    %19 = math.rsqrt %18 : vector<16x1xf32>
    %20 = vector.broadcast %19 : vector<16x1xf32> to vector<16x32xf32>
    %21 = arith.mulf %11, %20 : vector<16x32xf32>
    %c0_10 = arith.constant 0 : index
    %c0_11 = arith.constant 0 : index
    %22 = vector.load %arg4[%c0_10, %c0_11] : memref<1x32xf32, #tpu.memory_space<vmem>>, vector<1x32xf32>
    %23 = vector.broadcast %22 : vector<1x32xf32> to vector<16x32xf32>
    %24 = arith.mulf %21, %23 : vector<16x32xf32>
    %c0_12 = arith.constant 0 : index
    %c0_13 = arith.constant 0 : index
    %25 = vector.load %arg5[%c0_12, %c0_13] : memref<1x32xf32, #tpu.memory_space<vmem>>, vector<1x32xf32>
    %26 = vector.broadcast %25 : vector<1x32xf32> to vector<16x32xf32>
    %27 = arith.addf %24, %26 : vector<16x32xf32>
    %28 = arith.truncf %27 : vector<16x32xf32> to vector<16x32xbf16>
    %c0_14 = arith.constant 0 : index
    %c0_15 = arith.constant 0 : index
    %29 = vector.load %arg6[%c0_14, %c0_15] : memref<32x128xbf16, #tpu.memory_space<vmem>>, vector<32x128xbf16>
    %cst_16 = arith.constant dense<0.000000e+00> : vector<16x128xf32>
    %30 = tpu.matmul %28, %29, %cst_16 {dimension_numbers = #tpu.dot_dimension_numbers<[1], [0], [0], [1], [0, 0, 1, 1], [], []>} : vector<16x32xbf16>, vector<32x128xbf16>, vector<16x128xf32> -> vector<16x128xf32>
    %c0_17 = arith.constant 0 : index
    %c0_18 = arith.constant 0 : index
    %31 = vector.load %arg7[%c0_17, %c0_18] : memref<16x128xf32, #tpu.memory_space<vmem>>, vector<16x128xf32>
    tpu.vector_store %arg7[%c0_17, %c0_18], %30 {strides = array<i32>} : memref<16x128xf32, #tpu.memory_space<vmem>>, vector<16x128xf32>,
    return
  }
  func.func @transform_0(%arg0: i32) -> (i32, i32) {
    %c0_i32 = arith.constant 0 : i32
    %c0_i32_0 = arith.constant 0 : i32
    return %arg0, %c0_i32 : i32, i32
  }
  func.func @transform_1(%arg0: i32) -> (i32, i32) {
    %c0_i32 = arith.constant 0 : i32
    %c0_i32_0 = arith.constant 0 : i32
    %c0_i32_1 = arith.constant 0 : i32
    return %c0_i32, %c0_i32_0 : i32, i32
  }
  func.func @transform_2(%arg0: i32) -> (i32, i32) {
    %c0_i32 = arith.constant 0 : i32
    %c0_i32_0 = arith.constant 0 : i32
    %c0_i32_1 = arith.constant 0 : i32
    return %c0_i32, %c0_i32_0 : i32, i32
  }
  func.func @transform_3(%arg0: i32) -> (i32, i32) {
    %c0_i32 = arith.constant 0 : i32
    %c0_i32_0 = arith.constant 0 : i32
    %c0_i32_1 = arith.constant 0 : i32
    return %c0_i32, %c0_i32_0 : i32, i32
  }
  func.func @transform_4(%arg0: i32) -> (i32, i32) {
    %c0_i32 = arith.constant 0 : i32
    %c0_i32_0 = arith.constant 0 : i32
    %c0_i32_1 = arith.constant 0 : i32
    return %c0_i32, %c0_i32_0 : i32, i32
  }
  func.func @transform_5(%arg0: i32) -> (i32, i32) {
    %c0_i32 = arith.constant 0 : i32
    %c0_i32_0 = arith.constant 0 : i32
    %c0_i32_1 = arith.constant 0 : i32
    return %c0_i32, %c0_i32_0 : i32, i32
  }
  func.func @transform_6(%arg0: i32) -> (i32, i32) {
    %c0_i32 = arith.constant 0 : i32
    %c0_i32_0 = arith.constant 0 : i32
    return %arg0, %c0_i32 : i32, i32
  }
}

module attributes {stable_mosaic.version = 11 : i64} {
  func.func @esm_lm_head_kernel(%arg0: i32, %arg1: memref<16x32xbf16, #tpu.memory_space<vmem>>, %arg2: memref<32x32xbf16, #tpu.memory_space<vmem>>, %arg3: memref<1x32xf32, #tpu.memory_space<vmem>>, %arg4: memref<1x32xf32, #tpu.memory_space<vmem>>, %arg5: memref<1x32xf32, #tpu.memory_space<vmem>>, %arg6: memref<32x128xbf16, #tpu.memory_space<vmem>>, %arg7: memref<16x128xf32, #tpu.memory_space<vmem>>) attributes {dimension_semantics = [#tpu.dimension_semantics<parallel>], iteration_bounds = array<i64: 1>, scalar_prefetch = 0 : i64, scratch_operands = 0 : i64, tpu.core_type = #tpu.core_type<tc>, window_params = [{transform_indices = @transform_0, window_bounds = array<i64: 16, 32>}, {pipeline_mode = #tpu.pipeline_mode<synchronous>, transform_indices = @transform_1, window_bounds = array<i64: 32, 32>}, {pipeline_mode = #tpu.pipeline_mode<synchronous>, transform_indices = @transform_2, window_bounds = array<i64: 1, 32>}, {pipeline_mode = #tpu.pipeline_mode<synchronous>, transform_indices = @transform_3, window_bounds = array<i64: 1, 32>}, {pipeline_mode = #tpu.pipeline_mode<synchronous>, transform_indices = @transform_4, window_bounds = array<i64: 1, 32>}, {pipeline_mode = #tpu.pipeline_mode<synchronous>, transform_indices = @transform_5, window_bounds = array<i64: 32, 128>}, {transform_indices = @transform_6, window_bounds = array<i64: 16, 128>}]} {
    %c0 = arith.constant 0 : index
    %c0_0 = arith.constant 0 : index
    %0 = vector.load %arg1[%c0, %c0_0] : memref<16x32xbf16, #tpu.memory_space<vmem>>, vector<16x32xbf16>
    %c0_1 = arith.constant 0 : index
    %c0_2 = arith.constant 0 : index
    %1 = vector.load %arg2[%c0_1, %c0_2] : memref<32x32xbf16, #tpu.memory_space<vmem>>, vector<32x32xbf16>
    %cst = arith.constant dense<0.000000e+00> : vector<16x32xf32>
    %2 = tpu.matmul %0, %1, %cst {dimension_numbers = #tpu.dot_dimension_numbers<[1], [0], [0], [1], [0, 0, 1, 1], [], []>} : vector<16x32xbf16>, vector<32x32xbf16>, vector<16x32xf32> -> vector<16x32xf32>
    %c0_3 = arith.constant 0 : index
    %c0_4 = arith.constant 0 : index
    %3 = vector.load %arg3[%c0_3, %c0_4] : memref<1x32xf32, #tpu.memory_space<vmem>>, vector<1x32xf32>
    %4 = vector.broadcast %3 : vector<1x32xf32> to vector<16x32xf32>
    %5 = arith.addf %2, %4 : vector<16x32xf32>
    %cst_5 = arith.constant dense<0.000000e+00> : vector<16xf32>
    %6 = vector.multi_reduction <add>, %5, %cst_5 [1] : vector<16x32xf32> to vector<16xf32>
    %7 = vector.shape_cast %6 : vector<16xf32> to vector<16x1xf32>
    %cst_6 = arith.constant 3.200000e+01 : f32
    %8 = vector.broadcast %cst_6 : f32 to vector<16x1xf32>
    %9 = arith.divf %7, %8 : vector<16x1xf32>
    %10 = vector.broadcast %9 : vector<16x1xf32> to vector<16x32xf32>
    %11 = arith.subf %5, %10 : vector<16x32xf32>
    %12 = arith.mulf %11, %11 : vector<16x32xf32>
    %cst_7 = arith.constant dense<0.000000e+00> : vector<16xf32>
    %13 = vector.multi_reduction <add>, %12, %cst_7 [1] : vector<16x32xf32> to vector<16xf32>
    %14 = vector.shape_cast %13 : vector<16xf32> to vector<16x1xf32>
    %cst_8 = arith.constant 3.200000e+01 : f32
    %15 = vector.broadcast %cst_8 : f32 to vector<16x1xf32>
    %16 = arith.divf %14, %15 : vector<16x1xf32>
    %cst_9 = arith.constant 9.99999974E-6 : f32
    %17 = vector.broadcast %cst_9 : f32 to vector<16x1xf32>
    %18 = arith.addf %16, %17 : vector<16x1xf32>
    %19 = math.rsqrt %18 : vector<16x1xf32>
    %20 = vector.broadcast %19 : vector<16x1xf32> to vector<16x32xf32>
    %21 = arith.mulf %11, %20 : vector<16x32xf32>
    %c0_10 = arith.constant 0 : index
    %c0_11 = arith.constant 0 : index
    %22 = vector.load %arg4[%c0_10, %c0_11] : memref<1x32xf32, #tpu.memory_space<vmem>>, vector<1x32xf32>
    %23 = vector.broadcast %22 : vector<1x32xf32> to vector<16x32xf32>
    %24 = arith.mulf %21, %23 : vector<16x32xf32>
    %c0_12 = arith.constant 0 : index
    %c0_13 = arith.constant 0 : index
    %25 = vector.load %arg5[%c0_12, %c0_13] : memref<1x32xf32, #tpu.memory_space<vmem>>, vector<1x32xf32>
    %26 = vector.broadcast %25 : vector<1x32xf32> to vector<16x32xf32>
    %27 = arith.addf %24, %26 : vector<16x32xf32>
    %28 = arith.truncf %27 : vector<16x32xf32> to vector<16x32xbf16>
    %c0_14 = arith.constant 0 : index
    %c0_15 = arith.constant 0 : index
    %29 = vector.load %arg6[%c0_14, %c0_15] : memref<32x128xbf16, #tpu.memory_space<vmem>>, vector<32x128xbf16>
    %cst_16 = arith.constant dense<0.000000e+00> : vector<16x128xf32>
    %30 = tpu.matmul %28, %29, %cst_16 {dimension_numbers = #tpu.dot_dimension_numbers<[1], [0], [0], [1], [0, 0, 1, 1], [], []>} : vector<16x32xbf16>, vector<32x128xbf16>, vector<16x128xf32> -> vector<16x128xf32>
    %c0_17 = arith.constant 0 : index
    %c0_18 = arith.constant 0 : index
    %31 = vector.load %arg7[%c0_17, %c0_18] : memref<16x128xf32, #tpu.memory_space<vmem>>, vector<16x128xf32>
    tpu.vector_store %arg7[%c0_17, %c0_18], %30 {strides = array<i32>} : memref<16x128xf32, #tpu.memory_space<vmem>>, vector<16x128xf32>,
    return
  }
  func.func @transform_0(%arg0: i32) -> (i32, i32) {
    %c0_i32 = arith.constant 0 : i32
    %c0_i32_0 = arith.constant 0 : i32
    return %arg0, %c0_i32 : i32, i32
  }
  func.func @transform_1(%arg0: i32) -> (i32, i32) {
    %c0_i32 = arith.constant 0 : i32
    %c0_i32_0 = arith.constant 0 : i32
    %c0_i32_1 = arith.constant 0 : i32
    return %c0_i32, %c0_i32_0 : i32, i32
  }
  func.func @transform_2(%arg0: i32) -> (i32, i32) {
    %c0_i32 = arith.constant 0 : i32
    %c0_i32_0 = arith.constant 0 : i32
    %c0_i32_1 = arith.constant 0 : i32
    return %c0_i32, %c0_i32_0 : i32, i32
  }
  func.func @transform_3(%arg0: i32) -> (i32, i32) {
    %c0_i32 = arith.constant 0 : i32
    %c0_i32_0 = arith.constant 0 : i32
    %c0_i32_1 = arith.constant 0 : i32
    return %c0_i32, %c0_i32_0 : i32, i32
  }
  func.func @transform_4(%arg0: i32) -> (i32, i32) {
    %c0_i32 = arith.constant 0 : i32
    %c0_i32_0 = arith.constant 0 : i32
    %c0_i32_1 = arith.constant 0 : i32
    return %c0_i32, %c0_i32_0 : i32, i32
  }
  func.func @transform_5(%arg0: i32) -> (i32, i32) {
    %c0_i32 = arith.constant 0 : i32
    %c0_i32_0 = arith.constant 0 : i32
    %c0_i32_1 = arith.constant 0 : i32
    return %c0_i32, %c0_i32_0 : i32, i32
  }
  func.func @transform_6(%arg0: i32) -> (i32, i32) {
    %c0_i32 = arith.constant 0 : i32
    %c0_i32_0 = arith.constant 0 : i32
    return %arg0, %c0_i32 : i32, i32
  }
}

</mosaic_0001>

<bundles_post_ra>
// kernel: tpu_custom_call.1
= control target key start
LH: loop header
LB: loop body
LE: loop exit
PB: predicated region body
PF: predicated region fallthrough
CT: control target
= control target key end

     0   :  { %11 = vsyncpa [#allocation3], 0  ;;  %s454_s0 = inlined_call_operand.hbm [shape: bf16[16,32], index: 0, kind: input, shape index: {}]   ;;  %s455_s1 = inlined_call_operand.hbm [shape: bf16[32,32], index: 1, kind: input, shape index: {}]   ;;  %s456_s2 = inlined_call_operand.vmem [shape: f32[1,32], index: 2, kind: input, shape index: {}]   ;;  %s457_s3 = inlined_call_operand.vmem [shape: f32[1,32], index: 3, kind: input, shape index: {}]   ;;  %s458_s4 = inlined_call_operand.vmem [shape: f32[1,32], index: 4, kind: input, shape index: {}]   ;;  %s459_s5 = inlined_call_operand.hbm [shape: bf16[32,128], index: 5, kind: input, shape index: {}]   ;;  %s460_s6 = inlined_call_operand.hbm [shape: f32[16,128], index: 6, kind: output, shape index: {}]  }
   0x1   :  { %12 = vsyncpa [#allocation6], 0 }
   0x2   :  { %13 = vsyncpa [#allocation4], 0  ;;  %s31_s23 = sshll.u32 %s455_s1, 4  ;;  %s383_s24 = smov [#allocation5]   ;;  %s32_s23 = int_to_ptr.hbm [resolvable:$true] %s31_s23 }
   0x3   :  { %s33_s25 = sshll.u32 %s383_s24, 4  ;;  %s18_s28 = sshll.u32 %s454_s0, 4  ;;  %s34_s25 = int_to_ptr.vmem [resolvable:$true] %s33_s25  ;;  %s19_s28 = int_to_ptr.hbm [resolvable:$true] %s18_s28 }
   0x4   :  { %s384_s29 = smov 64   ;;  %s385_s30 = smov 4  }
   0x5   :  { %39 = dma.hbm_to_vmem [thread:$0]  %s32_s23, 256, %s34_s25, [#allocation6], %s384_s29, %s384_s29, %s385_s30  }
   0x6   :  { %s386_s7 = smov [#allocation2]   ;;  %s50_s11 = sshll.u32 %s459_s5, 4  ;;  %s51_s11 = int_to_ptr.hbm [resolvable:$true] %s50_s11 }
   0x7   :  { %s20_s8 = sshll.u32 %s386_s7, 4  ;;  %s387_s1 = smov [#allocation7]   ;;  %s21_s8 = int_to_ptr.vmem [resolvable:$true] %s20_s8 }
   0x8   :  { %26 = dma.hbm_to_vmem [thread:$0]  %s19_s28, 128, %s21_s8, [#allocation3], %s384_s29, %s384_s29, %s385_s30  }
   0x9   :  { %s52_s12 = sshll.u32 %s387_s1, 4  ;;  %s53_s12 = int_to_ptr.vmem [resolvable:$true] %s52_s12 }
   0xa   :  { %58 = dma.hbm_to_vmem [thread:$0]  %s51_s11, 256, %s53_s12, [#allocation6], %s384_s29, %s384_s29, %s385_s30  }
   0xb   :  { %377 = dma.done.wait [#allocation3], 128  }
   0xc   :  { %378 = vsyncadd [#allocation3], 4294967168 }
   0xd   :  { %379 = dma.done.wait [#allocation6], 512  }
   0xe   :  { %380 = vsyncadd [#allocation6], 4294966784  ;;  %v260_v0 = vld [vmem:[#allocation5 + $0x8] sm:$0xff]  ;;  %v259_v1 = vld [vmem:[#allocation5] sm:$0xff]  ;;  %vm99_vm0 = vcmask 261120   ;;  %v388_v10 = vmov 32.0  }
   0xf   :  { %109 = vmatpush.bf16.msra.mxu0 %v260_v0  ;;  %v258_v2 = vld [vmem:[#allocation2] sm:$0xff]  ;;  %275 = vrcp.f32 %v388_v10  ;;  %v261_v29 = vld [vmem:[#allocation7] sm:$0xff]  ;;  %s389_s16 = smov [#allocation8]   ;;  %s222_s19 = sshll.u32 %s460_s6, 4  ;;  %s223_s19 = int_to_ptr.hbm [resolvable:$true] %s222_s19 }
  0x10   :  { %v272_v3 = vld [vmem:[%s456_s2] ss:$0 sm:$0xff]  ;;  %s390_s20 = smov 128  }
  0x11   :  { %v262_v27 = vld [vmem:[#allocation7 + $0x8] sm:$0xff] }
  0x12   :  { %206 = vmatpush.bf16.msra.mxu1 %v262_v27  ;;  %v273_v48 = vld [vmem:[%s457_s3] ss:$0 sm:$0xff]  ;;  %s220_s3 = sshll.u32 %s389_s16, 4  ;;  %s221_s3 = int_to_ptr.vmem [resolvable:$true] %s220_s3 }
  0x13   :  { %110 = vmatpush.bf16.msra.mxu0 %v259_v1  ;;  %v274_v53 = vld [vmem:[%s458_s4] ss:$0 sm:$0xff]  ;;  %s391_s4 = smov 8  }
  0x15   :  { %v276_v11 = vpop.eup %275 }
  0x16   :  { %248 = vmatmul.msk.bf16.vlgmr.msra.gmra.mxu0 %vm99_vm0, %v258_v2  ;;  %v124_v12 = vmul.f32 32.0, %v276_v11  ;;  %vm128_vm1 = vweird.f32 %v276_v11  ;;  %207 = vmatpush.bf16.msra.mxu1 %v261_v29 }
  0x18   :  { %v125_v13 = vsub.f32 1.0, %v124_v12 }
  0x1a   :  { %v126_v14 = vmul.f32 %v276_v11, %v125_v13 }
  0x1c   :  { %v127_v15 = vadd.f32 %v276_v11, %v126_v14 }
  0x1e   :  { %v129_v16 = vsel %vm128_vm1, %v276_v11, %v127_v15 }
  0x93   :  { %v112_v4 = vpop.f32.mrf.mxu0 }
  0x94   :  { %v113_v5 = vadd.f32 %v272_v3, %v112_v4 }
  0x96   :  { %v117_v6 = vsel %vm99_vm0, %v113_v5, 0.0 }
  0x97   :  { %118 = vadd.xlane.f32.xlu0 %v117_v6 }
  0x9b   :  { %v114_v7 = vpop.f32.mrf.mxu0 }
  0x9c   :  { %v115_v8 = vadd.f32 %v272_v3, %v114_v7 }
  0x9e   :  { %v120_v9 = vsel %vm99_vm0, %v115_v8, 0.0 }
  0x9f   :  { %121 = vadd.xlane.f32.xlu0 %v120_v9 }
 0x10a   :  { %v119_v17 = vpop.xlane.xlu0 %118 }
 0x10b   :  { %v130_v18 = vmul.f32 %v129_v16, %v119_v17 }
 0x10d   :  { %v132_v19 = vsub.f32 %v113_v5, %v130_v18 }
 0x10f   :  { %v134_v20 = vmul.f32 %v132_v19, %v132_v19 }
 0x111   :  { %v136_v21 = vsel %vm99_vm0, %v134_v20, 0.0 }
 0x112   :  { %137 = vadd.xlane.f32.xlu1 %v136_v21  ;;  %v122_v22 = vpop.xlane.xlu0 %121 }
 0x113   :  { %v131_v23 = vmul.f32 %v129_v16, %v122_v22 }
 0x115   :  { %v133_v24 = vsub.f32 %v115_v8, %v131_v23 }
 0x117   :  { %v135_v25 = vmul.f32 %v133_v24, %v133_v24 }
 0x119   :  { %v139_v26 = vsel %vm99_vm0, %v135_v25, 0.0 }
 0x11a   :  { %140 = vadd.xlane.f32.xlu1 %v139_v26 }
 0x185   :  { %v138_v28 = vpop.xlane.xlu1 %137 }
 0x186   :  { %v142_v30 = vmul.f32 %v138_v28, %v129_v16 }
 0x188   :  { %v144_v31 = vadd.f32 1e-05, %v142_v30 }
 0x18a   :  { %277 = vrsqrt.f32 %v144_v31  ;;  %vm152_vm3 = vweird.f32 %v144_v31 }
 0x18d   :  { %v141_v32 = vpop.xlane.xlu1 %140 }
 0x18e   :  { %v143_v33 = vmul.f32 %v141_v32, %v129_v16 }
 0x190   :  { %v278_v34 = vpop.eup %277  ;;  %v145_v35 = vadd.f32 1e-05, %v143_v33 }
 0x191   :  { %v147_v36 = vmul.f32 %v278_v34, %v144_v31  ;;  %vm153_vm2 = vweird.f32 %v278_v34 }
 0x192   :  { %279 = vrsqrt.f32 %v145_v35  ;;  %vm154_vm4 = vmor %vm152_vm3, %vm153_vm2  ;;  %vm162_vm6 = vweird.f32 %v145_v35 }
 0x193   :  { %v148_v37 = vmul.f32 %v278_v34, %v147_v36 }
 0x195   :  { %v149_v38 = vmul.f32 0.5, %v148_v37 }
 0x197   :  { %v150_v39 = vsub.f32 1.5, %v149_v38 }
 0x198   :  { %v280_v40 = vpop.eup %279 }
 0x199   :  { %v151_v41 = vmul.f32 %v278_v34, %v150_v39  ;;  %v157_v42 = vmul.f32 %v280_v40, %v145_v35  ;;  %vm163_vm5 = vweird.f32 %v280_v40 }
 0x19a   :  { %vm164_vm7 = vmor %vm162_vm6, %vm163_vm5 }
 0x19b   :  { %v158_v43 = vmul.f32 %v280_v40, %v157_v42  ;;  %v155_v44 = vsel %vm154_vm4, %v278_v34, %v151_v41 }
 0x19c   :  { %v166_v47 = vmul.f32 %v155_v44, %v132_v19 }
 0x19d   :  { %v159_v45 = vmul.f32 0.5, %v158_v43 }
 0x19e   :  { %v172_v52 = vmul.f32 %v273_v48, %v166_v47 }
 0x19f   :  { %v160_v46 = vsub.f32 1.5, %v159_v45 }
 0x1a0   :  { %v178_v55 = vadd.f32 %v274_v53, %v172_v52 }
 0x1a1   :  { %v161_v49 = vmul.f32 %v280_v40, %v160_v46 }
 0x1a3   :  { %v165_v50 = vsel %vm164_vm7, %v280_v40, %v161_v49 }
 0x1a4   :  { %v167_v51 = vmul.f32 %v165_v50, %v133_v24 }
 0x1a6   :  { %v173_v54 = vmul.f32 %v273_v48, %v167_v51 }
 0x1a8   :  { %v179_v56 = vadd.f32 %v274_v53, %v173_v54 }
 0x1aa   :  { %v180_v57 = vpack.c.bf16 %v179_v56, %v178_v55 }
 0x1ac   :  { %257 = vmatmul.msk.bf16.vlgmr.msra.gmra.mxu1 %vm99_vm0, %v180_v57 }
 0x229   :  { %v209_v58 = vpop.f32.mrf.mxu1 }
 0x22a   :  { %214 = vst [vmem:[#allocation8] sm:$0xff] %v209_v58 }
 0x231   :  { %v211_v59 = vpop.f32.mrf.mxu1 }
 0x232   :  { %215 = vst [vmem:[#allocation8 + $0x8] sm:$0xff] %v211_v59 }
 0x233   :  { %228 = dma.vmem_to_hbm [thread:$0]  %s221_s3, 256, %s223_s19, [#allocation4], %s390_s20, %s390_s20, %s391_s4  }
 0x234   :  { %381 = dma.done.wait [#allocation4], 256  }
 0x235   :  { %382 = vsyncadd [#allocation4], 4294967040 }
 0x236   :  { %233 = vsyncpa [#allocation3], 1 }
 0x237   :  { %234 = vsyncpa [#allocation6], 1 }
 0x238   :  { %235 = vsyncpa [#allocation4], 1 }

// kernel: tpu_custom_call.1
= control target key start
LH: loop header
LB: loop body
LE: loop exit
PB: predicated region body
PF: predicated region fallthrough
CT: control target
= control target key end

     0   :  { %11 = vsyncpa [#allocation3], 0  ;;  %s454_s0 = inlined_call_operand.hbm [shape: bf16[16,32], index: 0, kind: input, shape index: {}]   ;;  %s455_s1 = inlined_call_operand.hbm [shape: bf16[32,32], index: 1, kind: input, shape index: {}]   ;;  %s456_s2 = inlined_call_operand.vmem [shape: f32[1,32], index: 2, kind: input, shape index: {}]   ;;  %s457_s3 = inlined_call_operand.vmem [shape: f32[1,32], index: 3, kind: input, shape index: {}]   ;;  %s458_s4 = inlined_call_operand.vmem [shape: f32[1,32], index: 4, kind: input, shape index: {}]   ;;  %s459_s5 = inlined_call_operand.hbm [shape: bf16[32,128], index: 5, kind: input, shape index: {}]   ;;  %s460_s6 = inlined_call_operand.hbm [shape: f32[16,128], index: 6, kind: output, shape index: {}]  }
   0x1   :  { %12 = vsyncpa [#allocation6], 0 }
   0x2   :  { %13 = vsyncpa [#allocation4], 0  ;;  %s31_s23 = sshll.u32 %s455_s1, 4  ;;  %s383_s24 = smov [#allocation5]   ;;  %s32_s23 = int_to_ptr.hbm [resolvable:$true] %s31_s23 }
   0x3   :  { %s33_s25 = sshll.u32 %s383_s24, 4  ;;  %s18_s28 = sshll.u32 %s454_s0, 4  ;;  %s34_s25 = int_to_ptr.vmem [resolvable:$true] %s33_s25  ;;  %s19_s28 = int_to_ptr.hbm [resolvable:$true] %s18_s28 }
   0x4   :  { %s384_s29 = smov 64   ;;  %s385_s30 = smov 4  }
   0x5   :  { %39 = dma.hbm_to_vmem [thread:$0]  %s32_s23, 256, %s34_s25, [#allocation6], %s384_s29, %s384_s29, %s385_s30  }
   0x6   :  { %s386_s7 = smov [#allocation2]   ;;  %s50_s11 = sshll.u32 %s459_s5, 4  ;;  %s51_s11 = int_to_ptr.hbm [resolvable:$true] %s50_s11 }
   0x7   :  { %s20_s8 = sshll.u32 %s386_s7, 4  ;;  %s387_s1 = smov [#allocation7]   ;;  %s21_s8 = int_to_ptr.vmem [resolvable:$true] %s20_s8 }
   0x8   :  { %26 = dma.hbm_to_vmem [thread:$0]  %s19_s28, 128, %s21_s8, [#allocation3], %s384_s29, %s384_s29, %s385_s30  }
   0x9   :  { %s52_s12 = sshll.u32 %s387_s1, 4  ;;  %s53_s12 = int_to_ptr.vmem [resolvable:$true] %s52_s12 }
   0xa   :  { %58 = dma.hbm_to_vmem [thread:$0]  %s51_s11, 256, %s53_s12, [#allocation6], %s384_s29, %s384_s29, %s385_s30  }
   0xb   :  { %377 = dma.done.wait [#allocation3], 128  }
   0xc   :  { %378 = vsyncadd [#allocation3], 4294967168 }
   0xd   :  { %379 = dma.done.wait [#allocation6], 512  }
   0xe   :  { %380 = vsyncadd [#allocation6], 4294966784  ;;  %v260_v0 = vld [vmem:[#allocation5 + $0x8] sm:$0xff]  ;;  %v259_v1 = vld [vmem:[#allocation5] sm:$0xff]  ;;  %vm99_vm0 = vcmask 261120   ;;  %v388_v10 = vmov 32.0  }
   0xf   :  { %109 = vmatpush.bf16.msra.mxu0 %v260_v0  ;;  %v258_v2 = vld [vmem:[#allocation2] sm:$0xff]  ;;  %275 = vrcp.f32 %v388_v10  ;;  %v261_v29 = vld [vmem:[#allocation7] sm:$0xff]  ;;  %s389_s16 = smov [#allocation8]   ;;  %s222_s19 = sshll.u32 %s460_s6, 4  ;;  %s223_s19 = int_to_ptr.hbm [resolvable:$true] %s222_s19 }
  0x10   :  { %v272_v3 = vld [vmem:[%s456_s2] ss:$0 sm:$0xff]  ;;  %s390_s20 = smov 128  }
  0x11   :  { %v262_v27 = vld [vmem:[#allocation7 + $0x8] sm:$0xff] }
  0x12   :  { %206 = vmatpush.bf16.msra.mxu1 %v262_v27  ;;  %v273_v48 = vld [vmem:[%s457_s3] ss:$0 sm:$0xff]  ;;  %s220_s3 = sshll.u32 %s389_s16, 4  ;;  %s221_s3 = int_to_ptr.vmem [resolvable:$true] %s220_s3 }
  0x13   :  { %110 = vmatpush.bf16.msra.mxu0 %v259_v1  ;;  %v274_v53 = vld [vmem:[%s458_s4] ss:$0 sm:$0xff]  ;;  %s391_s4 = smov 8  }
  0x15   :  { %v276_v11 = vpop.eup %275 }
  0x16   :  { %248 = vmatmul.msk.bf16.vlgmr.msra.gmra.mxu0 %vm99_vm0, %v258_v2  ;;  %v124_v12 = vmul.f32 32.0, %v276_v11  ;;  %vm128_vm1 = vweird.f32 %v276_v11  ;;  %207 = vmatpush.bf16.msra.mxu1 %v261_v29 }
  0x18   :  { %v125_v13 = vsub.f32 1.0, %v124_v12 }
  0x1a   :  { %v126_v14 = vmul.f32 %v276_v11, %v125_v13 }
  0x1c   :  { %v127_v15 = vadd.f32 %v276_v11, %v126_v14 }
  0x1e   :  { %v129_v16 = vsel %vm128_vm1, %v276_v11, %v127_v15 }
  0x93   :  { %v112_v4 = vpop.f32.mrf.mxu0 }
  0x94   :  { %v113_v5 = vadd.f32 %v272_v3, %v112_v4 }
  0x96   :  { %v117_v6 = vsel %vm99_vm0, %v113_v5, 0.0 }
  0x97   :  { %118 = vadd.xlane.f32.xlu0 %v117_v6 }
  0x9b   :  { %v114_v7 = vpop.f32.mrf.mxu0 }
  0x9c   :  { %v115_v8 = vadd.f32 %v272_v3, %v114_v7 }
  0x9e   :  { %v120_v9 = vsel %vm99_vm0, %v115_v8, 0.0 }
  0x9f   :  { %121 = vadd.xlane.f32.xlu0 %v120_v9 }
 0x10a   :  { %v119_v17 = vpop.xlane.xlu0 %118 }
 0x10b   :  { %v130_v18 = vmul.f32 %v129_v16, %v119_v17 }
 0x10d   :  { %v132_v19 = vsub.f32 %v113_v5, %v130_v18 }
 0x10f   :  { %v134_v20 = vmul.f32 %v132_v19, %v132_v19 }
 0x111   :  { %v136_v21 = vsel %vm99_vm0, %v134_v20, 0.0 }
 0x112   :  { %137 = vadd.xlane.f32.xlu1 %v136_v21  ;;  %v122_v22 = vpop.xlane.xlu0 %121 }
 0x113   :  { %v131_v23 = vmul.f32 %v129_v16, %v122_v22 }
 0x115   :  { %v133_v24 = vsub.f32 %v115_v8, %v131_v23 }
 0x117   :  { %v135_v25 = vmul.f32 %v133_v24, %v133_v24 }
 0x119   :  { %v139_v26 = vsel %vm99_vm0, %v135_v25, 0.0 }
 0x11a   :  { %140 = vadd.xlane.f32.xlu1 %v139_v26 }
 0x185   :  { %v138_v28 = vpop.xlane.xlu1 %137 }
 0x186   :  { %v142_v30 = vmul.f32 %v138_v28, %v129_v16 }
 0x188   :  { %v144_v31 = vadd.f32 1e-05, %v142_v30 }
 0x18a   :  { %277 = vrsqrt.f32 %v144_v31  ;;  %vm152_vm3 = vweird.f32 %v144_v31 }
 0x18d   :  { %v141_v32 = vpop.xlane.xlu1 %140 }
 0x18e   :  { %v143_v33 = vmul.f32 %v141_v32, %v129_v16 }
 0x190   :  { %v278_v34 = vpop.eup %277  ;;  %v145_v35 = vadd.f32 1e-05, %v143_v33 }
 0x191   :  { %v147_v36 = vmul.f32 %v278_v34, %v144_v31  ;;  %vm153_vm2 = vweird.f32 %v278_v34 }
 0x192   :  { %279 = vrsqrt.f32 %v145_v35  ;;  %vm154_vm4 = vmor %vm152_vm3, %vm153_vm2  ;;  %vm162_vm6 = vweird.f32 %v145_v35 }
 0x193   :  { %v148_v37 = vmul.f32 %v278_v34, %v147_v36 }
 0x195   :  { %v149_v38 = vmul.f32 0.5, %v148_v37 }
 0x197   :  { %v150_v39 = vsub.f32 1.5, %v149_v38 }
 0x198   :  { %v280_v40 = vpop.eup %279 }
 0x199   :  { %v151_v41 = vmul.f32 %v278_v34, %v150_v39  ;;  %v157_v42 = vmul.f32 %v280_v40, %v145_v35  ;;  %vm163_vm5 = vweird.f32 %v280_v40 }
 0x19a   :  { %vm164_vm7 = vmor %vm162_vm6, %vm163_vm5 }
 0x19b   :  { %v158_v43 = vmul.f32 %v280_v40, %v157_v42  ;;  %v155_v44 = vsel %vm154_vm4, %v278_v34, %v151_v41 }
 0x19c   :  { %v166_v47 = vmul.f32 %v155_v44, %v132_v19 }
 0x19d   :  { %v159_v45 = vmul.f32 0.5, %v158_v43 }
 0x19e   :  { %v172_v52 = vmul.f32 %v273_v48, %v166_v47 }
 0x19f   :  { %v160_v46 = vsub.f32 1.5, %v159_v45 }
 0x1a0   :  { %v178_v55 = vadd.f32 %v274_v53, %v172_v52 }
 0x1a1   :  { %v161_v49 = vmul.f32 %v280_v40, %v160_v46 }
 0x1a3   :  { %v165_v50 = vsel %vm164_vm7, %v280_v40, %v161_v49 }
 0x1a4   :  { %v167_v51 = vmul.f32 %v165_v50, %v133_v24 }
 0x1a6   :  { %v173_v54 = vmul.f32 %v273_v48, %v167_v51 }
 0x1a8   :  { %v179_v56 = vadd.f32 %v274_v53, %v173_v54 }
 0x1aa   :  { %v180_v57 = vpack.c.bf16 %v179_v56, %v178_v55 }
 0x1ac   :  { %257 = vmatmul.msk.bf16.vlgmr.msra.gmra.mxu1 %vm99_vm0, %v180_v57 }
 0x229   :  { %v209_v58 = vpop.f32.mrf.mxu1 }
 0x22a   :  { %214 = vst [vmem:[#allocation8] sm:$0xff] %v209_v58 }
 0x231   :  { %v211_v59 = vpop.f32.mrf.mxu1 }
 0x232   :  { %215 = vst [vmem:[#allocation8 + $0x8] sm:$0xff] %v211_v59 }
 0x233   :  { %228 = dma.vmem_to_hbm [thread:$0]  %s221_s3, 256, %s223_s19, [#allocation4], %s390_s20, %s390_s20, %s391_s4  }
 0x234   :  { %381 = dma.done.wait [#allocation4], 256  }
 0x235   :  { %382 = vsyncadd [#allocation4], 4294967040 }
 0x236   :  { %233 = vsyncpa [#allocation3], 1 }
 0x237   :  { %234 = vsyncpa [#allocation6], 1 }
 0x238   :  { %235 = vsyncpa [#allocation4], 1 }

</bundles_post_ra>
